<compile_context>
chip_gen: v5e
topology: v5e:2x2
jax: 0.10.0
libtpu: 0.0.40
codegen_flags: <defaults>
</compile_context>

<pallas_src>
import functools

import jax
import jax.numpy as jnp
import numpy as np
from jax.experimental import pallas as pl
from jax.experimental.pallas import tpu as pltpu

_LANES = 128


def _round_up(x: int, m: int) -> int:
    return ((x + m - 1) // m) * m


def _bbox_l1_kernel(pred_ref, true_ref, osum_ref, acc_ref, *, sigma_squared: float):
    """Streams one (br, 128) f32 tile per step and folds it into an (8, 128) accumulator."""
    step = pl.program_id(1)  # inner ("arbitrary") reduction axis; axis 0 is per-core

    @pl.when(step == 0)
    def _():
        acc_ref[...] = jnp.zeros_like(acc_ref)

    diff = jnp.abs(pred_ref[...] - true_ref[...])            # (br, 128) f32
    smooth_l1 = jnp.where(
        diff < (1.0 / sigma_squared),
        (0.5 * sigma_squared) * diff * diff,
        diff - 0.5 / sigma_squared,
    )

    # Vreg-wise fold into an (8, 128) accumulator: reshape groups whole (8, 128)
    # vreg tiles along the leading axis, so the axis-0 sum is pure VPU adds (no XLU).
    br = smooth_l1.shape[0]
    acc_ref[...] += jnp.sum(smooth_l1.reshape(br // 8, 8, _LANES), axis=0)

    @pl.when(step == pl.num_programs(1) - 1)
    def _():
        osum_ref[...] = acc_ref[...]                          # lane-dense (8, 128) store


@functools.partial(jax.jit,
                   static_argnames=("sigma", "weights", "block_rows", "num_cores"))
def bbox_l1_loss(y_pred, y_true, *, sigma: int = 1, weights: int = 1,
                 block_rows: int = 4096, num_cores: int = 1):
    """Pallas equivalent of BBOXL1Loss.forward.

    y_pred: (..., >=4) float; y_true: (..., >=5) float. Returns a scalar f32 loss.
    """
    sigma_squared = float(sigma) ** 2

    pred = jnp.asarray(y_pred[..., :4], jnp.float32)
    true = jnp.asarray(y_true[..., :4], jnp.float32)
    state = jnp.asarray(y_true[..., 4], jnp.float32)
    mask_bool = (1.0 - state) == 1.0                          # per-anchor selection

    # Fold the selection into the target stream: unselected anchors get target ==
    # prediction, so their smooth-L1 contribution is exactly zero.  The where()
    # fuses with the y_true[..., :4] slice copy that already has to happen.
    # TODO(synk): if pred may hold inf/NaN at masked-out anchors, zero-fill both
    # operands instead (where(mask, pred, 0) / where(mask, true, 0)) to avoid NaN.
    true_masked = jnp.where(mask_bool[..., None], true, pred)

    # Normalizer count computed directly in the wrapper (fuses with the state read).
    num_selected = jnp.sum(mask_bool.astype(jnp.float32))

    # Flat, anchor-major (coords innermost) — free reshape, no transpose.
    pred_flat = pred.reshape(-1)                              # (4N,)
    true_flat = true_masked.reshape(-1)                       # (4N,)

    total = pred_flat.shape[0]                                # 4N (static)
    rows = max(-(-total // _LANES), 1)

    nc = max(int(num_cores), 1)
    # Pick the step count for the target block size, then spread rows as evenly as
    # possible over nc*steps blocks at 8-row granularity so zero-padding stays tiny
    # (no full-array pad pass for typical shapes).
    tgt_br = max(8, _round_up(int(block_rows), 8))
    steps = max(-(-rows // (nc * tgt_br)), 1)
    br = _round_up(-(-rows // (nc * steps)), 8)
    rows_padded = nc * steps * br
    pad = rows_padded * _LANES - total
    if pad:
        pred_flat = jnp.pad(pred_flat, (0, pad))              # zeros contribute 0 loss
        true_flat = jnp.pad(true_flat, (0, pad))

    pred2 = pred_flat.reshape(rows_padded, _LANES)
    true2 = true_flat.reshape(rows_padded, _LANES)

    kernel = functools.partial(_bbox_l1_kernel, sigma_squared=sigma_squared)

    data_spec = pl.BlockSpec((br, _LANES), lambda c, s: (c * steps + s, 0))
    out_spec = pl.BlockSpec((8, _LANES), lambda c, s: (c, 0))

    stream_bytes = 2 * rows_padded * _LANES * 4 + nc * 8 * _LANES * 4

    osum = pl.pallas_call(
        kernel,
        out_shape=jax.ShapeDtypeStruct((nc * 8, _LANES), jnp.float32),
        grid_spec=pltpu.PrefetchScalarGridSpec(
            num_scalar_prefetch=0,
            grid=(nc, steps),
            in_specs=[data_spec, data_spec],
            out_specs=out_spec,
            scratch_shapes=[pltpu.VMEM((8, _LANES), jnp.float32)],  # running partials
        ),
        compiler_params=pltpu.CompilerParams(
            dimension_semantics=("parallel", "arbitrary"),
        ),
        cost_estimate=pl.CostEstimate(
            flops=9 * rows_padded * _LANES,
            transcendentals=0,
            bytes_accessed=stream_bytes,
        ),
    )(pred2, true2)

    # Tiny final reduction (nc*8*128 elements) + normalization in the wrapper.
    total_sum = jnp.sum(osum)
    normalizer = jnp.maximum(jnp.float32(1.0), num_selected)
    return total_sum / normalizer * jnp.float32(weights)


def _reference(y_pred, y_true, sigma=1, weights=1):
    sigma_squared = float(sigma) ** 2
    pred = np.asarray(y_pred[..., :4], np.float32)
    tgt = np.asarray(y_true[..., :4], np.float32)
    anchor_state = 1.0 - np.asarray(y_true[..., 4], np.float32)
    m = anchor_state == 1.0
    pred = pred[m]
    tgt = tgt[m]
    diff = np.abs(pred - tgt)
    loss = np.where(diff < 1.0 / sigma_squared,
                    0.5 * sigma_squared * diff ** 2,
                    diff - 0.5 / sigma_squared)
    normalizer = max(1.0, float(diff.shape[0]))
    return float(loss.astype(np.float64).sum() / normalizer * weights)


if __name__ == "__main__":
    key = jax.random.PRNGKey(0)
    k1, k2, k3 = jax.random.split(key, 3)

    batch, num_anchors = 2, 256
    y_pred = jax.random.normal(k1, (batch, num_anchors, 4), dtype=jnp.float32)
    boxes = jax.random.normal(k2, (batch, num_anchors, 4), dtype=jnp.float32)
    # y_true[..., 4] == 0  -> anchor is used (anchor_state == 1)
    states = jax.random.bernoulli(k3, p=0.5, shape=(batch, num_anchors, 1)).astype(jnp.float32)
    y_true = jnp.concatenate([boxes, states], axis=-1)

    loss = bbox_l1_loss(y_pred, y_true, sigma=1, weights=1)
    loss = jax.block_until_ready(loss)

    ref = _reference(np.asarray(y_pred), np.asarray(y_true), sigma=1, weights=1)
    np.testing.assert_allclose(float(loss), ref, rtol=1e-4, atol=1e-5)

    print("KERNEL_OK")
</pallas_src>

<mosaic_0001>
module attributes {stable_mosaic.version = 11 : i64} {
  func.func @_bbox_l1_kernel(%arg0: i32, %arg1: i32, %arg2: memref<16x128xf32, #tpu.memory_space<vmem>>, %arg3: memref<16x128xf32, #tpu.memory_space<vmem>>, %arg4: memref<8x128xf32, #tpu.memory_space<vmem>>, %arg5: memref<8x128xf32, #tpu.memory_space<vmem>>) attributes {dimension_semantics = [#tpu.dimension_semantics<parallel>, #tpu.dimension_semantics<arbitrary>], iteration_bounds = array<i64: 1, 1>, scalar_prefetch = 0 : i64, scratch_operands = 1 : i64, tpu.core_type = #tpu.core_type<tc>, window_params = [{transform_indices = @transform_0, window_bounds = array<i64: 16, 128>}, {transform_indices = @transform_1, window_bounds = array<i64: 16, 128>}, {transform_indices = @transform_2, window_bounds = array<i64: 8, 128>}]} {
    %c0_i32 = arith.constant 0 : i32
    %0 = arith.cmpi eq, %arg1, %c0_i32 : i32
    %1 = arith.extui %0 : i1 to i32
    %c0_i32_0 = arith.constant 0 : i32
    %2 = arith.cmpi ne, %1, %c0_i32_0 : i32
    scf.if %2 {
      %cst_13 = arith.constant 0.000000e+00 : f32
      %23 = vector.broadcast %cst_13 : f32 to vector<8x128xf32>
      %c0_14 = arith.constant 0 : index
      %c0_15 = arith.constant 0 : index
      %24 = vector.load %arg5[%c0_14, %c0_15] : memref<8x128xf32, #tpu.memory_space<vmem>>, vector<8x128xf32>
      tpu.vector_store %arg5[%c0_14, %c0_15], %23 {strides = array<i32>} : memref<8x128xf32, #tpu.memory_space<vmem>>, vector<8x128xf32>,
    } else {
    }
    %c0 = arith.constant 0 : index
    %c0_1 = arith.constant 0 : index
    %3 = vector.load %arg2[%c0, %c0_1] : memref<16x128xf32, #tpu.memory_space<vmem>>, vector<16x128xf32>
    %c0_2 = arith.constant 0 : index
    %c0_3 = arith.constant 0 : index
    %4 = vector.load %arg3[%c0_2, %c0_3] : memref<16x128xf32, #tpu.memory_space<vmem>>, vector<16x128xf32>
    %5 = arith.subf %3, %4 : vector<16x128xf32>
    %6 = math.absf %5 : vector<16x128xf32>
    %cst = arith.constant 1.000000e+00 : f32
    %7 = vector.broadcast %cst : f32 to vector<16x128xf32>
    %8 = arith.cmpf olt, %6, %7 : vector<16x128xf32>
    %cst_4 = arith.constant 5.000000e-01 : f32
    %9 = vector.broadcast %cst_4 : f32 to vector<16x128xf32>
    %10 = arith.mulf %9, %6 : vector<16x128xf32>
    %11 = arith.mulf %10, %6 : vector<16x128xf32>
    %cst_5 = arith.constant 5.000000e-01 : f32
    %12 = vector.broadcast %cst_5 : f32 to vector<16x128xf32>
    %13 = arith.subf %6, %12 : vector<16x128xf32>
    %14 = arith.select %8, %11, %13 : vector<16x128xi1>, vector<16x128xf32>
    %c0_6 = arith.constant 0 : index
    %c0_7 = arith.constant 0 : index
    %15 = vector.load %arg5[%c0_6, %c0_7] : memref<8x128xf32, #tpu.memory_space<vmem>>, vector<8x128xf32>
    %16 = vector.shape_cast %14 : vector<16x128xf32> to vector<2x8x128xf32>
    %cst_8 = arith.constant dense<0.000000e+00> : vector<8x128xf32>
    %17 = vector.multi_reduction <add>, %16, %cst_8 [0] : vector<2x8x128xf32> to vector<8x128xf32>
    %18 = arith.addf %15, %17 : vector<8x128xf32>
    %c0_9 = arith.constant 0 : index
    %c0_10 = arith.constant 0 : index
    %19 = vector.load %arg5[%c0_9, %c0_10] : memref<8x128xf32, #tpu.memory_space<vmem>>, vector<8x128xf32>
    tpu.vector_store %arg5[%c0_9, %c0_10], %18 {strides = array<i32>} : memref<8x128xf32, #tpu.memory_space<vmem>>, vector<8x128xf32>,
    %c0_i32_11 = arith.constant 0 : i32
    %20 = arith.cmpi eq, %arg1, %c0_i32_11 : i32
    %21 = arith.extui %20 : i1 to i32
    %c0_i32_12 = arith.constant 0 : i32
    %22 = arith.cmpi ne, %21, %c0_i32_12 : i32
    scf.if %22 {
      %c0_13 = arith.constant 0 : index
      %c0_14 = arith.constant 0 : index
      %23 = vector.load %arg5[%c0_13, %c0_14] : memref<8x128xf32, #tpu.memory_space<vmem>>, vector<8x128xf32>
      %c0_15 = arith.constant 0 : index
      %c0_16 = arith.constant 0 : index
      %24 = vector.load %arg4[%c0_15, %c0_16] : memref<8x128xf32, #tpu.memory_space<vmem>>, vector<8x128xf32>
      tpu.vector_store %arg4[%c0_15, %c0_16], %23 {strides = array<i32>} : memref<8x128xf32, #tpu.memory_space<vmem>>, vector<8x128xf32>,
    } else {
    }
    return
  }
  func.func @transform_0(%arg0: i32, %arg1: i32) -> (i32, i32) {
    %c1_i32 = arith.constant 1 : i32
    %0 = arith.muli %arg0, %c1_i32 : i32
    %1 = arith.addi %0, %arg1 : i32
    %c0_i32 = arith.constant 0 : i32
    %c0_i32_0 = arith.constant 0 : i32
    return %1, %c0_i32 : i32, i32
  }
  func.func @transform_1(%arg0: i32, %arg1: i32) -> (i32, i32) {
    %c1_i32 = arith.constant 1 : i32
    %0 = arith.muli %arg0, %c1_i32 : i32
    %1 = arith.addi %0, %arg1 : i32
    %c0_i32 = arith.constant 0 : i32
    %c0_i32_0 = arith.constant 0 : i32
    return %1, %c0_i32 : i32, i32
  }
  func.func @transform_2(%arg0: i32, %arg1: i32) -> (i32, i32) {
    %c0_i32 = arith.constant 0 : i32
    %c0_i32_0 = arith.constant 0 : i32
    return %arg0, %c0_i32 : i32, i32
  }
}

</mosaic_0001>

<bundles_post_ra>
// kernel: bbox_l1_loss.1
= control target key start
LH: loop header
LB: loop body
LE: loop exit
PB: predicated region body
PF: predicated region fallthrough
CT: control target
= control target key end

     0   :  { %s135_s0 = inlined_call_operand.vmem [shape: f32[16,128], index: 0, kind: input, shape index: {}]   ;;  %s136_s1 = inlined_call_operand.vmem [shape: f32[16,128], index: 1, kind: input, shape index: {}]   ;;  %s137_s2 = inlined_call_operand.vmem [shape: f32[8,128], index: 2, kind: output, shape index: {}]  }
   0x1   :  { %v60_v0 = vld [vmem:[%s135_s0] sm:$0xff]  ;;  %v61_v1 = vld [vmem:[%s135_s0 + $0x8] sm:$0xff] }
   0x2   :  { %v62_v2 = vld [vmem:[%s136_s1] sm:$0xff]  ;;  %v63_v3 = vld [vmem:[%s136_s1 + $0x8] sm:$0xff] }
   0x3   :  { %v64_v4 = vsub.f32 %v60_v0, %v62_v2  ;;  %v65_v5 = vsub.f32 %v61_v1, %v63_v3 }
   0x5   :  { %v66_v6 = vand.u32 2147483647, %v64_v4  ;;  %v67_v7 = vand.u32 2147483647, %v65_v5 }
   0x7   :  { %v70_v8 = vmul.f32 0.5, %v66_v6  ;;  %v103_v9 = vadd.f32 -0.5, %v66_v6  ;;  %vm68_vm0 = vcmp.lt.f32.partialorder %v66_v6, 1.0  ;;  %v71_v10 = vmul.f32 0.5, %v67_v7 }
   0x8   :  { %v104_v11 = vadd.f32 -0.5, %v67_v7  ;;  %vm69_vm1 = vcmp.lt.f32.partialorder %v67_v7, 1.0 }
   0x9   :  { %v72_v12 = vmul.f32 %v70_v8, %v66_v6  ;;  %v73_v13 = vmul.f32 %v71_v10, %v67_v7 }
   0xb   :  { %v76_v14 = vsel %vm68_vm0, %v72_v12, %v103_v9  ;;  %v77_v15 = vsel %vm69_vm1, %v73_v13, %v104_v11 }
   0xc   :  { %v79_v16 = vadd.f32 %v77_v15, %v76_v14 }
   0xe   :  { %86 = vst [vmem:[%s137_s2] sm:$0xff] %v79_v16 }

</bundles_post_ra>
